<compile_context>
chip_gen: v6e
topology: v6e:2x2x1
jax: 0.10.0
libtpu: 0.0.40
codegen_flags: <defaults>
</compile_context>

<pallas_src>
import jax
import jax.numpy as jnp
from jax.experimental import pallas as pl
from jax.experimental.pallas import tpu as pltpu


# ----------------------------------------------------------------------------
# Path 1: single strided HBM->HBM DMA (large per-row kept bytes).
# ----------------------------------------------------------------------------
def _chomp1d_dma_kernel(x_hbm, o_hbm, sem):
    """Single grid step: DMA x[:, :, :l_out] (strided HBM view) -> out (HBM)."""
    l_out = o_hbm.shape[-1]
    cp = pltpu.make_async_copy(
        # Strided source view: N*C rows of length l_out, row stride L.
        x_hbm.at[:, :, pl.ds(0, l_out)],
        # Fully contiguous destination slab.
        o_hbm,
        sem,
    )
    cp.start()
    cp.wait()


def _chomp1d_dma(x: jax.Array, l_out: int) -> jax.Array:
    n, c, l = x.shape
    bytes_accessed = 2 * n * c * l_out * x.dtype.itemsize  # read + write kept bytes
    return pl.pallas_call(
        _chomp1d_dma_kernel,
        out_shape=jax.ShapeDtypeStruct((n, c, l_out), x.dtype),
        grid_spec=pltpu.PrefetchScalarGridSpec(
            num_scalar_prefetch=0,
            grid=(1,),  # one step -> issue/wait cost paid exactly once
            in_specs=[pl.BlockSpec(memory_space=pl.ANY)],   # stay in HBM
            out_specs=pl.BlockSpec(memory_space=pl.ANY),    # stay in HBM
            scratch_shapes=[pltpu.SemaphoreType.DMA(())],   # explicit sem shape
        ),
        compiler_params=pltpu.CompilerParams(
            dimension_semantics=("arbitrary",),
        ),
        cost_estimate=pl.CostEstimate(
            flops=0, transcendentals=0, bytes_accessed=bytes_accessed
        ),
    )(x)


# ----------------------------------------------------------------------------
# Path 2: VMEM-routed tiled copy (small per-row kept bytes).
# ----------------------------------------------------------------------------
def _chomp1d_vmem_kernel(x_ref, o_ref):
    l_out = o_ref.shape[-1]
    o_ref[...] = x_ref[:, :l_out]


def _chomp1d_vmem(x: jax.Array, l_out: int) -> jax.Array:
    n, c, l = x.shape
    rows = n * c
    itemsize = x.dtype.itemsize
    x2 = x.reshape(rows, l)

    # Size row tiles for the smallest VMEM generation (v7x: 64 MiB phys /
    # 32 MiB scoped).  Input tile (rows x L) + output tile (rows x l_out),
    # x2 for double buffering, kept well under budget with headroom.
    vmem_budget = 16 * 1024 * 1024
    bytes_per_row = 2 * (l + l_out) * itemsize  # x2: double-buffered in + out
    max_rows = max(8, vmem_budget // max(bytes_per_row, 1))
    if rows <= max_rows:
        block_rows = rows                      # full extent: exempt from (8,128) rule
    else:
        block_rows = min((max_rows // 8) * 8, 2048)  # big tiles amortize ~0.35us/step

    grid = (pl.cdiv(rows, block_rows),)
    out2 = pl.pallas_call(
        _chomp1d_vmem_kernel,
        out_shape=jax.ShapeDtypeStruct((rows, l_out), x.dtype),
        grid_spec=pltpu.PrefetchScalarGridSpec(
            num_scalar_prefetch=0,
            grid=grid,
            in_specs=[pl.BlockSpec((block_rows, l), lambda i: (i, 0))],
            out_specs=pl.BlockSpec((block_rows, l_out), lambda i: (i, 0)),
        ),
        compiler_params=pltpu.CompilerParams(
            dimension_semantics=("parallel",),
        ),
        cost_estimate=pl.CostEstimate(
            flops=0,
            transcendentals=0,
            bytes_accessed=rows * (l + l_out) * itemsize,
        ),
    )(x2)
    return out2.reshape(n, c, l_out)


# ----------------------------------------------------------------------------
# Public wrapper (matches Chomp1d.forward semantics for chomp_size > 0).
# ----------------------------------------------------------------------------
def chomp1d(x: jax.Array, chomp_size: int) -> jax.Array:
    """Drop the trailing `chomp_size` entries along the last axis of (N, C, L)."""
    assert x.ndim == 3, "expected (N, C, L) input"
    n, c, l = x.shape
    assert 0 <= chomp_size < l, "chomp_size must satisfy 0 <= chomp_size < L"
    if chomp_size == 0:
        # TCN usage never hits this; return the input unchanged (note that a
        # literal x[:, :, :-0] in Python/PyTorch would be an empty slice).
        return x
    l_out = l - chomp_size

    # Strided HBM->HBM DMA is only efficient when each contiguous kept run is
    # reasonably long; otherwise route through VMEM with lane-dense tiles.
    if l_out * x.dtype.itemsize >= 512:
        return _chomp1d_dma(x, l_out)
    return _chomp1d_vmem(x, l_out)


if __name__ == "__main__":
    key = jax.random.PRNGKey(0)

    # 1) Small TCN-style shape (per-row kept bytes = 13*4 = 52 B -> VMEM path).
    N, C, L, chomp = 2, 4, 16, 3
    x = jax.random.normal(key, (N, C, L), dtype=jnp.float32)
    out = jax.block_until_ready(chomp1d(x, chomp))
    ref = x[:, :, :-chomp]
    assert out.shape == (N, C, L - chomp), out.shape
    assert jnp.array_equal(out, ref), "VMEM path mismatch vs reference slice"

    # 2) Larger rows (kept bytes = 144*4 = 576 B -> single strided-DMA path).
    N2, C2, L2, chomp2 = 2, 4, 160, 16
    x2 = jax.random.normal(jax.random.PRNGKey(0), (N2, C2, L2), dtype=jnp.float32)
    out2 = jax.block_until_ready(chomp1d(x2, chomp2))
    ref2 = x2[:, :, :-chomp2]
    assert out2.shape == (N2, C2, L2 - chomp2), out2.shape
    assert jnp.array_equal(out2, ref2), "DMA path mismatch vs reference slice"

    print("KERNEL_OK")
</pallas_src>

<mosaic_0001>
module attributes {stable_mosaic.version = 11 : i64} {
  func.func @_chomp1d_vmem_kernel(%arg0: i32, %arg1: memref<8x16xf32, #tpu.memory_space<vmem>>, %arg2: memref<8x13xf32, #tpu.memory_space<vmem>>) attributes {dimension_semantics = [#tpu.dimension_semantics<parallel>], iteration_bounds = array<i64: 1>, scalar_prefetch = 0 : i64, scratch_operands = 0 : i64, tpu.core_type = #tpu.core_type<tc>, window_params = [{transform_indices = @transform_0, window_bounds = array<i64: 8, 16>}, {transform_indices = @transform_1, window_bounds = array<i64: 8, 13>}]} {
    %c0 = arith.constant 0 : index
    %c0_0 = arith.constant 0 : index
    %0 = vector.load %arg1[%c0, %c0_0] : memref<8x16xf32, #tpu.memory_space<vmem>>, vector<8x13xf32>
    %c0_1 = arith.constant 0 : index
    %c0_2 = arith.constant 0 : index
    %1 = vector.load %arg2[%c0_1, %c0_2] : memref<8x13xf32, #tpu.memory_space<vmem>>, vector<8x13xf32>
    tpu.vector_store %arg2[%c0_1, %c0_2], %0 {strides = array<i32>} : memref<8x13xf32, #tpu.memory_space<vmem>>, vector<8x13xf32>,
    return
  }
  func.func @transform_0(%arg0: i32) -> (i32, i32) {
    %c0_i32 = arith.constant 0 : i32
    %c0_i32_0 = arith.constant 0 : i32
    return %arg0, %c0_i32 : i32, i32
  }
  func.func @transform_1(%arg0: i32) -> (i32, i32) {
    %c0_i32 = arith.constant 0 : i32
    %c0_i32_0 = arith.constant 0 : i32
    return %arg0, %c0_i32 : i32, i32
  }
}

</mosaic_0001>

<bundles_post_ra>
// kernel: tpu_custom_call.1
= control target key start
LH: loop header
LB: loop body
LE: loop exit
PB: predicated region body
PF: predicated region fallthrough
CT: control target
= control target key end

     0   :  { %6 = vsyncpa [#allocation3], 0  ;;  %s103_s0 = inlined_call_operand.hbm [shape: f32[8,16], index: 0, kind: input, shape index: {}]   ;;  %s104_s1 = inlined_call_operand.hbm [shape: f32[8,13], index: 1, kind: output, shape index: {}]  }
   0x1   :  { %7 = vsyncpa [#allocation4], 0  ;;  %s85_s6 = smov [#allocation2]  }
   0x2   :  { %s14_s7 = sshll.u32 %s85_s6, 4  ;;  %s15_s7 = int_to_ptr.vmem [resolvable:$true] %s14_s7 }
   0x3   :  { %s49_s8 = scalar_lea.vmem %s15_s7, 128  ;;  %p54_p1 = scmp.lt.s32.totalorder %s15_s7, %s15_s7 }
   0x4   :  { %p50_p0 = scmp.ne.s32.totalorder %s15_s7, %s49_s8  ;;  %p55_p2 = scmp.lt.s32.totalorder %s49_s8, %s49_s8 }
   0x6   :  { %p56_p3 = por %p55_p2, %p54_p1 }
   0x8   :  { %p57_p4 = pnand %p56_p3, %p50_p0 }
   0xa   :  { %60 = shalt.err (!%p57_p4)
}
   0xb   :  { %17 = dma.hbm_to_vmem [thread:$0]  %s103_s0, 128, %s15_s7, [#allocation3]  }
   0xc   :  { %81 = dma.done.wait [#allocation3], 128  }
   0xd   :  { %82 = vsyncadd [#allocation3], 4294967168  ;;  %s86_s11 = smov [#allocation5]   ;;  %vm22_vm0 = vcmask 105472   ;;  %v21_v0 = vld [vmem:[#allocation2] sm:$0xff] }
   0xe   :  { %s30_s12 = sshll.u32 %s86_s11, 4  ;;  %23 = vst.msk [vmem:[#allocation5] sm:$0xff] %vm22_vm0, %v21_v0  ;;  %s31_s12 = int_to_ptr.vmem [resolvable:$true] %s30_s12 }
   0xf   :  { %s61_s13 = scalar_lea.vmem %s31_s12, 128  ;;  %p66_p6 = scmp.lt.s32.totalorder %s31_s12, %s31_s12 }
  0x10   :  { %p62_p5 = scmp.ne.s32.totalorder %s31_s12, %s61_s13  ;;  %p67_p7 = scmp.lt.s32.totalorder %s61_s13, %s61_s13 }
  0x12   :  { %p68_p8 = por %p67_p7, %p66_p6 }
  0x14   :  { %p69_p9 = pnand %p68_p8, %p62_p5 }
  0x16   :  { %72 = shalt.err (!%p69_p9)
}
  0x17   :  { %33 = dma.vmem_to_hbm [thread:$0]  %s31_s12, 128, %s104_s1, [#allocation4]  }
  0x18   :  { %83 = dma.done.wait [#allocation4], 128  }
  0x19   :  { %84 = vsyncadd [#allocation4], 4294967168 }
  0x1a   :  { %37 = vsyncpa [#allocation3], 1 }
  0x1b   :  { %38 = vsyncpa [#allocation4], 1 }

</bundles_post_ra>
